<compile_context>
chip_gen: v7x
topology: tpu7x:2x2x1
jax: 0.10.0
libtpu: 0.0.40
codegen_flags: <defaults>
</compile_context>

<pallas_src>
import jax
import jax.numpy as jnp
from jax.experimental import pallas as pl
from jax.experimental.pallas import tpu as pltpu

EPS = 1e-5  # torch.nn.LayerNorm default


def _round_up(x, m):
    return ((x + m - 1) // m) * m


def _tpu_vmem_capacity_bytes():
    """Physical VMEM per TensorCore; conservative fallback if query fails."""
    try:
        return int(pltpu.get_tpu_info().vmem_capacity_bytes)
    except Exception:
        return 64 * 1024 * 1024  # v7x per-TC VMEM (smallest of the three gens)


def prenorm_kernel(x_ref, gamma_ref, beta_ref, w_ref, bias_ref, o_ref, y_ref):
    """LayerNorm (f32 stats) + Linear, fused in VMEM.

    Grid = (row tiles i, output/N tiles j), j innermost.  The normalized
    activations are computed once per row tile (j == 0) into the VMEM scratch
    `y_ref` and reused for every N tile, so the VPU-heavy LN work is not
    repeated per j.
    """
    j = pl.program_id(1)

    @pl.when(j == 0)
    def _():
        # --- LayerNorm statistics in f32 over the lane (last) axis ----------
        x = x_ref[...].astype(jnp.float32)                        # (tm, dim)
        mean = jnp.mean(x, axis=-1, keepdims=True)                 # (tm, 1)
        centered = x - mean
        var = jnp.mean(centered * centered, axis=-1, keepdims=True)
        inv_std = jax.lax.rsqrt(var + EPS)
        # gamma/beta arrive pre-cast to f32 (host side) — no per-step casts.
        y = centered * inv_std * gamma_ref[...] + beta_ref[...]    # f32
        y_ref[...] = y.astype(y_ref.dtype)                         # matmul dtype

    # --- fn: Linear(dim -> tn) on the MXU with an f32 accumulator ----------
    out = jnp.dot(y_ref[...], w_ref[...], preferred_element_type=jnp.float32)
    out = out + bias_ref[...]                                      # f32 bias
    o_ref[...] = out.astype(o_ref.dtype)


def _pick_tiles(rows, dim, n_pad, x_itemsize, w_itemsize, out_itemsize,
                tm_req, tn_req, budget):
    """Largest (tm, tn) whose VMEM footprint fits the budget.

    Prefers a large row tile (outer loop): W HBM traffic is
    (rows/tm) * dim * n_pad bytes, so doubling tm halves weight re-reads,
    while tn does not change HBM traffic (LN is hoisted, so small tn only
    costs per-grid-step overhead).
    """
    row_mult = 256   # MXU-friendly on v6e/v7x; a multiple of 128 for v5e
    lane_mult = 128

    tm_hi = max(row_mult, min(_round_up(tm_req, row_mult),
                              _round_up(rows, row_mult)))
    tn_hi = max(lane_mult, min(_round_up(tn_req, lane_mult), n_pad))

    def est(tm, tn):
        return (2 * tm * dim * x_itemsize          # x tile (double-buffered)
                + 2 * dim * tn * w_itemsize        # W tile (double-buffered)
                + 2 * tm * tn * out_itemsize       # out tile (double-buffered)
                + 2 * (2 * dim + tn) * 4           # gamma/beta/bias tiles
                + tm * dim * w_itemsize            # normalized-y VMEM scratch
                + 4 * tm * dim * 4                 # f32 LN intermediates
                + tm * tn * 4)                     # f32 matmul result

    tm_cands = sorted({tm_hi} | {m for m in (2048, 1024, 512, 256) if m <= tm_hi},
                      reverse=True)
    tn_cands = sorted({tn_hi} | {m for m in (2048, 1024, 512, 256, 128) if m <= tn_hi},
                      reverse=True)

    for tm in tm_cands:
        for tn in tn_cands:
            if est(tm, tn) <= budget:
                return tm, tn, est(tm, tn)
    tm, tn = tm_cands[-1], tn_cands[-1]
    return tm, tn, est(tm, tn)


def prenorm_forward(x, gamma, beta, w, bias, bucket_size, *, tm=1024, tn=512):
    """x: (batch, seq, dim).  bucket_size is passed through to `fn`; the
    synthetic fn (Linear) does not consume it — kept for API parity."""
    del bucket_size  # fn here is a Linear head; bucket_size unused.
    batch, seq, dim = x.shape
    rows = batch * seq

    x_itemsize = jnp.dtype(x.dtype).itemsize
    w_itemsize = jnp.dtype(w.dtype).itemsize
    out_itemsize = x_itemsize

    # Generation-aware VMEM budget (~48 MiB on v7x's 64 MiB, ~96 MiB on the
    # 128 MiB v5e/v6e parts) with compiler-internal-scratch headroom.
    vmem_cap = _tpu_vmem_capacity_bytes()
    budget = int(0.75 * vmem_cap)

    # Lane-dense output: pad N to a multiple of 128, then of tn_eff.
    n_pad = _round_up(dim, 128)
    tm_eff, tn_eff, est = _pick_tiles(rows, dim, n_pad, x_itemsize, w_itemsize,
                                      out_itemsize, tm, tn, budget)
    n_pad = _round_up(n_pad, tn_eff)
    rows_pad = _round_up(rows, tm_eff)

    vmem_limit = int(min(max(budget, int(1.25 * est), 32 * 1024 * 1024),
                         vmem_cap))

    # Host-side packing / padding (zeros are benign: padded rows are sliced
    # away, padded W columns / bias are zero so padded outputs are discarded).
    x2 = x.reshape(rows, dim)
    if rows_pad != rows:
        x2 = jnp.pad(x2, ((0, rows_pad - rows), (0, 0)))
    gamma2 = gamma.reshape(1, dim).astype(jnp.float32)
    beta2 = beta.reshape(1, dim).astype(jnp.float32)
    w2 = w if n_pad == dim else jnp.pad(w, ((0, 0), (0, n_pad - dim)))
    bias2 = bias.reshape(1, dim).astype(jnp.float32)
    if n_pad != dim:
        bias2 = jnp.pad(bias2, ((0, 0), (0, n_pad - dim)))

    grid = (rows_pad // tm_eff, n_pad // tn_eff)

    cost = pl.CostEstimate(
        flops=int(2 * rows_pad * dim * n_pad + 8 * rows_pad * dim),
        transcendentals=int(rows_pad),
        bytes_accessed=int(rows_pad * dim * x_itemsize
                           + (rows_pad // tm_eff) * dim * n_pad * w_itemsize
                           + rows_pad * n_pad * out_itemsize
                           + 3 * dim * 4 + n_pad * 4),
    )

    out = pl.pallas_call(
        prenorm_kernel,
        out_shape=jax.ShapeDtypeStruct((rows_pad, n_pad), x.dtype),
        grid_spec=pltpu.PrefetchScalarGridSpec(
            num_scalar_prefetch=0,
            grid=grid,
            in_specs=[
                pl.BlockSpec((tm_eff, dim), lambda i, j: (i, 0)),   # x rows
                pl.BlockSpec((1, dim), lambda i, j: (0, 0)),        # gamma
                pl.BlockSpec((1, dim), lambda i, j: (0, 0)),        # beta
                pl.BlockSpec((dim, tn_eff), lambda i, j: (0, j)),   # W N-tile
                pl.BlockSpec((1, tn_eff), lambda i, j: (0, j)),     # bias
            ],
            out_specs=pl.BlockSpec((tm_eff, tn_eff), lambda i, j: (i, j)),
            scratch_shapes=[pltpu.VMEM((tm_eff, dim), w2.dtype)],   # normalized y
        ),
        compiler_params=pltpu.CompilerParams(
            # Row axis sharded across TensorCores; N axis "arbitrary" so the
            # j==0 LN-scratch carry is preserved under megacore sharding.
            dimension_semantics=("parallel", "arbitrary"),
            vmem_limit_bytes=vmem_limit,
        ),
        cost_estimate=cost,
    )(x2, gamma2, beta2, w2, bias2)

    return out[:rows, :dim].reshape(batch, seq, dim)


def prenorm_reference(x, gamma, beta, w, bias):
    xf = x.astype(jnp.float32)
    mean = jnp.mean(xf, axis=-1, keepdims=True)
    var = jnp.mean((xf - mean) ** 2, axis=-1, keepdims=True)
    xn = (xf - mean) * jax.lax.rsqrt(var + EPS)
    y = xn * gamma + beta
    return (y @ w + bias).astype(x.dtype)


if __name__ == "__main__":
    key = jax.random.PRNGKey(0)
    batch, seq, dim = 2, 8, 32
    bucket_size = 4  # passed through to fn (unused by the Linear head)

    kx, kg, kb, kw, kbi = jax.random.split(key, 5)
    x = jax.random.normal(kx, (batch, seq, dim), dtype=jnp.float32)

    # LayerNorm params (perturbed from torch's ones/zeros init to exercise the
    # scale/shift path); small random Linear params.
    gamma = 1.0 + 0.1 * jax.random.normal(kg, (dim,), dtype=jnp.float32)
    beta = 0.1 * jax.random.normal(kb, (dim,), dtype=jnp.float32)
    w = jax.random.normal(kw, (dim, dim), dtype=jnp.float32) * (1.0 / dim**0.5)
    bias = jax.random.normal(kbi, (dim,), dtype=jnp.float32) * 0.01

    out = prenorm_forward(x, gamma, beta, w, bias, bucket_size)
    out = jax.block_until_ready(out)

    ref = prenorm_reference(x, gamma, beta, w, bias)
    assert out.shape == (batch, seq, dim)
    assert jnp.allclose(out, ref, atol=1e-4, rtol=1e-4), "mismatch vs reference"

    print("KERNEL_OK")
</pallas_src>

<mosaic_0001>
module attributes {stable_mosaic.version = 11 : i64} {
  func.func @prenorm_kernel(%arg0: i32, %arg1: i32, %arg2: memref<256x32xf32, #tpu.memory_space<vmem>>, %arg3: memref<1x32xf32, #tpu.memory_space<vmem>>, %arg4: memref<1x32xf32, #tpu.memory_space<vmem>>, %arg5: memref<32x128xf32, #tpu.memory_space<vmem>>, %arg6: memref<1x128xf32, #tpu.memory_space<vmem>>, %arg7: memref<256x128xf32, #tpu.memory_space<vmem>>, %arg8: memref<256x32xf32, #tpu.memory_space<vmem>>) attributes {dimension_semantics = [#tpu.dimension_semantics<parallel>, #tpu.dimension_semantics<arbitrary>], iteration_bounds = array<i64: 1, 1>, scalar_prefetch = 0 : i64, scratch_operands = 1 : i64, tpu.core_type = #tpu.core_type<tc>, window_params = [{transform_indices = @transform_0, window_bounds = array<i64: 256, 32>}, {pipeline_mode = #tpu.pipeline_mode<synchronous>, transform_indices = @transform_1, window_bounds = array<i64: 1, 32>}, {pipeline_mode = #tpu.pipeline_mode<synchronous>, transform_indices = @transform_2, window_bounds = array<i64: 1, 32>}, {transform_indices = @transform_3, window_bounds = array<i64: 32, 128>}, {transform_indices = @transform_4, window_bounds = array<i64: 1, 128>}, {transform_indices = @transform_5, window_bounds = array<i64: 256, 128>}]} {
    %c0_i32 = arith.constant 0 : i32
    %0 = arith.cmpi eq, %arg1, %c0_i32 : i32
    %1 = arith.extui %0 : i1 to i32
    %c0_i32_0 = arith.constant 0 : i32
    %2 = arith.cmpi ne, %1, %c0_i32_0 : i32
    scf.if %2 {
      %c0_8 = arith.constant 0 : index
      %c0_9 = arith.constant 0 : index
      %10 = vector.load %arg2[%c0_8, %c0_9] : memref<256x32xf32, #tpu.memory_space<vmem>>, vector<256x32xf32>
      %cst_10 = arith.constant dense<0.000000e+00> : vector<256xf32>
      %11 = vector.multi_reduction <add>, %10, %cst_10 [1] : vector<256x32xf32> to vector<256xf32>
      %12 = vector.shape_cast %11 : vector<256xf32> to vector<256x1xf32>
      %cst_11 = arith.constant 3.200000e+01 : f32
      %13 = vector.broadcast %cst_11 : f32 to vector<256x1xf32>
      %14 = arith.divf %12, %13 : vector<256x1xf32>
      %15 = vector.broadcast %14 : vector<256x1xf32> to vector<256x32xf32>
      %16 = arith.subf %10, %15 : vector<256x32xf32>
      %17 = arith.mulf %16, %16 : vector<256x32xf32>
      %cst_12 = arith.constant dense<0.000000e+00> : vector<256xf32>
      %18 = vector.multi_reduction <add>, %17, %cst_12 [1] : vector<256x32xf32> to vector<256xf32>
      %19 = vector.shape_cast %18 : vector<256xf32> to vector<256x1xf32>
      %cst_13 = arith.constant 3.200000e+01 : f32
      %20 = vector.broadcast %cst_13 : f32 to vector<256x1xf32>
      %21 = arith.divf %19, %20 : vector<256x1xf32>
      %cst_14 = arith.constant 9.99999974E-6 : f32
      %22 = vector.broadcast %cst_14 : f32 to vector<256x1xf32>
      %23 = arith.addf %21, %22 : vector<256x1xf32>
      %24 = math.rsqrt %23 : vector<256x1xf32>
      %25 = vector.broadcast %24 : vector<256x1xf32> to vector<256x32xf32>
      %26 = arith.mulf %16, %25 : vector<256x32xf32>
      %c0_15 = arith.constant 0 : index
      %c0_16 = arith.constant 0 : index
      %27 = vector.load %arg3[%c0_15, %c0_16] : memref<1x32xf32, #tpu.memory_space<vmem>>, vector<1x32xf32>
      %28 = vector.broadcast %27 : vector<1x32xf32> to vector<256x32xf32>
      %29 = arith.mulf %26, %28 : vector<256x32xf32>
      %c0_17 = arith.constant 0 : index
      %c0_18 = arith.constant 0 : index
      %30 = vector.load %arg4[%c0_17, %c0_18] : memref<1x32xf32, #tpu.memory_space<vmem>>, vector<1x32xf32>
      %31 = vector.broadcast %30 : vector<1x32xf32> to vector<256x32xf32>
      %32 = arith.addf %29, %31 : vector<256x32xf32>
      %c0_19 = arith.constant 0 : index
      %c0_20 = arith.constant 0 : index
      %33 = vector.load %arg8[%c0_19, %c0_20] : memref<256x32xf32, #tpu.memory_space<vmem>>, vector<256x32xf32>
      tpu.vector_store %arg8[%c0_19, %c0_20], %32 {strides = array<i32>} : memref<256x32xf32, #tpu.memory_space<vmem>>, vector<256x32xf32>,
    } else {
    }
    %c0 = arith.constant 0 : index
    %c0_1 = arith.constant 0 : index
    %3 = vector.load %arg8[%c0, %c0_1] : memref<256x32xf32, #tpu.memory_space<vmem>>, vector<256x32xf32>
    %c0_2 = arith.constant 0 : index
    %c0_3 = arith.constant 0 : index
    %4 = vector.load %arg5[%c0_2, %c0_3] : memref<32x128xf32, #tpu.memory_space<vmem>>, vector<32x128xf32>
    %cst = arith.constant dense<0.000000e+00> : vector<256x128xf32>
    %5 = tpu.matmul %3, %4, %cst {dimension_numbers = #tpu.dot_dimension_numbers<[1], [0], [0], [1], [0, 0, 1, 1], [], []>} : vector<256x32xf32>, vector<32x128xf32>, vector<256x128xf32> -> vector<256x128xf32>
    %c0_4 = arith.constant 0 : index
    %c0_5 = arith.constant 0 : index
    %6 = vector.load %arg6[%c0_4, %c0_5] : memref<1x128xf32, #tpu.memory_space<vmem>>, vector<1x128xf32>
    %7 = vector.broadcast %6 : vector<1x128xf32> to vector<256x128xf32>
    %8 = arith.addf %5, %7 : vector<256x128xf32>
    %c0_6 = arith.constant 0 : index
    %c0_7 = arith.constant 0 : index
    %9 = vector.load %arg7[%c0_6, %c0_7] : memref<256x128xf32, #tpu.memory_space<vmem>>, vector<256x128xf32>
    tpu.vector_store %arg7[%c0_6, %c0_7], %8 {strides = array<i32>} : memref<256x128xf32, #tpu.memory_space<vmem>>, vector<256x128xf32>,
    return
  }
  func.func @transform_0(%arg0: i32, %arg1: i32) -> (i32, i32) {
    %c0_i32 = arith.constant 0 : i32
    %c0_i32_0 = arith.constant 0 : i32
    return %arg0, %c0_i32 : i32, i32
  }
  func.func @transform_1(%arg0: i32, %arg1: i32) -> (i32, i32) {
    %c0_i32 = arith.constant 0 : i32
    %c0_i32_0 = arith.constant 0 : i32
    %c0_i32_1 = arith.constant 0 : i32
    return %c0_i32, %c0_i32_0 : i32, i32
  }
  func.func @transform_2(%arg0: i32, %arg1: i32) -> (i32, i32) {
    %c0_i32 = arith.constant 0 : i32
    %c0_i32_0 = arith.constant 0 : i32
    %c0_i32_1 = arith.constant 0 : i32
    return %c0_i32, %c0_i32_0 : i32, i32
  }
  func.func @transform_3(%arg0: i32, %arg1: i32) -> (i32, i32) {
    %c0_i32 = arith.constant 0 : i32
    %c0_i32_0 = arith.constant 0 : i32
    return %c0_i32, %arg1 : i32, i32
  }
  func.func @transform_4(%arg0: i32, %arg1: i32) -> (i32, i32) {
    %c0_i32 = arith.constant 0 : i32
    %c0_i32_0 = arith.constant 0 : i32
    return %c0_i32, %arg1 : i32, i32
  }
  func.func @transform_5(%arg0: i32, %arg1: i32) -> (i32, i32) {
    %c0_i32 = arith.constant 0 : i32
    return %arg0, %arg1 : i32, i32
  }
}

</mosaic_0001>

<bundles_post_ra>
// kernel: tpu_custom_call.1
= control target key start
LH: loop header
LB: loop body
LE: loop exit
PB: predicated region body
PF: predicated region fallthrough
CT: control target
= control target key end

     0   :  { %vm57_vm0 = vcmask 261120   ;;  %s1908_s0 = inlined_call_operand.vmem [shape: f32[256,32], index: 0, kind: input, shape index: {}]   ;;  %s1909_s1 = inlined_call_operand.vmem [shape: f32[1,32], index: 1, kind: input, shape index: {}]   ;;  %s1910_s2 = inlined_call_operand.vmem [shape: f32[1,32], index: 2, kind: input, shape index: {}]   ;;  %s1911_s3 = inlined_call_operand.vmem [shape: f32[32,128], index: 3, kind: input, shape index: {}]   ;;  %s1912_s4 = inlined_call_operand.vmem [shape: f32[1,128], index: 4, kind: input, shape index: {}]   ;;  %s1913_s5 = inlined_call_operand.hbm [shape: f32[256,128], index: 5, kind: output, shape index: {}]  }
   0x1   :  { %v1264_v0 = vld [vmem:[%s1908_s0] sm:$0xff]  ;;  %v1269_v1 = vld [vmem:[%s1908_s0 + $0x8] sm:$0xff]  ;;  %v1292_v8 = vld [vmem:[%s1908_s0 + $0x10] sm:$0xff] }
   0x2   :  { %v1274_v2 = vld [vmem:[%s1908_s0 + $0x80] sm:$0xff]  ;;  %v58_v3 = vsel %vm57_vm0, %v1264_v0, 0.0  ;;  %v61_v4 = vsel %vm57_vm0, %v1269_v1, 0.0  ;;  %v1283_v5 = vld [vmem:[%s1908_s0 + $0x88] sm:$0xff]  ;;  %v1297_v9 = vld [vmem:[%s1908_s0 + $0x90] sm:$0xff]  ;;  %v64_v10 = vsel %vm57_vm0, %v1292_v8, 0.0 }
   0x3   :  { %59 = vadd.xlane.f32.xlu0 %v58_v3  ;;  %62 = vadd.xlane.f32.xlu1 %v61_v4  ;;  %v106_v6 = vsel %vm57_vm0, %v1274_v2, 0.0  ;;  %v109_v7 = vsel %vm57_vm0, %v1283_v5, 0.0  ;;  %v112_v11 = vsel %vm57_vm0, %v1297_v9, 0.0  ;;  %v1306_v12 = vld [vmem:[%s1908_s0 + $0x18] sm:$0xff] }
   0x4   :  { %v1311_v13 = vld [vmem:[%s1908_s0 + $0x98] sm:$0xff]  ;;  %v67_v14 = vsel %vm57_vm0, %v1306_v12, 0.0 }
   0x5   :  { %v115_v15 = vsel %vm57_vm0, %v1311_v13, 0.0 }
   0x7   :  { %107 = vadd.xlane.f32.xlu0 %v106_v6  ;;  %110 = vadd.xlane.f32.xlu1 %v109_v7 }
   0xb   :  { %65 = vadd.xlane.f32.xlu0 %v64_v10  ;;  %113 = vadd.xlane.f32.xlu1 %v112_v11 }
   0xc   :  { %10 = vsyncpa [#allocation4], 0  ;;  %v1320_v16 = vld [vmem:[%s1908_s0 + $0x20] sm:$0xff]  ;;  %v1334_v20 = vld [vmem:[%s1908_s0 + $0x28] sm:$0xff] }
   0xd   :  { %v1325_v17 = vld [vmem:[%s1908_s0 + $0xa0] sm:$0xff]  ;;  %v70_v18 = vsel %vm57_vm0, %v1320_v16, 0.0  ;;  %v1339_v21 = vld [vmem:[%s1908_s0 + $0xa8] sm:$0xff]  ;;  %v73_v22 = vsel %vm57_vm0, %v1334_v20, 0.0  ;;  %v1348_v24 = vld [vmem:[%s1908_s0 + $0x30] sm:$0xff] }
   0xe   :  { %v118_v19 = vsel %vm57_vm0, %v1325_v17, 0.0  ;;  %v121_v23 = vsel %vm57_vm0, %v1339_v21, 0.0  ;;  %v1353_v25 = vld [vmem:[%s1908_s0 + $0xb0] sm:$0xff]  ;;  %v76_v26 = vsel %vm57_vm0, %v1348_v24, 0.0  ;;  %v1362_v28 = vld [vmem:[%s1908_s0 + $0x38] sm:$0xff]  ;;  %v1376_v32 = vld [vmem:[%s1908_s0 + $0x40] sm:$0xff] }
   0xf   :  { %68 = vadd.xlane.f32.xlu0 %v67_v14  ;;  %116 = vadd.xlane.f32.xlu1 %v115_v15  ;;  %v124_v27 = vsel %vm57_vm0, %v1353_v25, 0.0  ;;  %v1367_v29 = vld [vmem:[%s1908_s0 + $0xb8] sm:$0xff]  ;;  %v79_v30 = vsel %vm57_vm0, %v1362_v28, 0.0  ;;  %v1381_v33 = vld [vmem:[%s1908_s0 + $0xc0] sm:$0xff]  ;;  %v82_v34 = vsel %vm57_vm0, %v1376_v32, 0.0  ;;  %v1390_v36 = vld [vmem:[%s1908_s0 + $0x48] sm:$0xff] }
  0x10   :  { %v127_v31 = vsel %vm57_vm0, %v1367_v29, 0.0  ;;  %v130_v35 = vsel %vm57_vm0, %v1381_v33, 0.0  ;;  %v1395_v37 = vld [vmem:[%s1908_s0 + $0xc8] sm:$0xff]  ;;  %v85_v38 = vsel %vm57_vm0, %v1390_v36, 0.0  ;;  %v1404_v40 = vld [vmem:[%s1908_s0 + $0x50] sm:$0xff]  ;;  %v1418_v44 = vld [vmem:[%s1908_s0 + $0x58] sm:$0xff] }
  0x11   :  { %v133_v39 = vsel %vm57_vm0, %v1395_v37, 0.0  ;;  %v1409_v41 = vld [vmem:[%s1908_s0 + $0xd0] sm:$0xff]  ;;  %v88_v42 = vsel %vm57_vm0, %v1404_v40, 0.0  ;;  %v1423_v45 = vld [vmem:[%s1908_s0 + $0xd8] sm:$0xff]  ;;  %v91_v46 = vsel %vm57_vm0, %v1418_v44, 0.0  ;;  %v1432_v48 = vld [vmem:[%s1908_s0 + $0x60] sm:$0xff] }
  0x12   :  { %v136_v43 = vsel %vm57_vm0, %v1409_v41, 0.0  ;;  %v139_v47 = vsel %vm57_vm0, %v1423_v45, 0.0  ;;  %v1437_v49 = vld [vmem:[%s1908_s0 + $0xe0] sm:$0xff]  ;;  %v94_v50 = vsel %vm57_vm0, %v1432_v48, 0.0  ;;  %v1446_v52 = vld [vmem:[%s1908_s0 + $0x68] sm:$0xff]  ;;  %v1460_v56 = vld [vmem:[%s1908_s0 + $0x70] sm:$0xff] }
  0x13   :  { %71 = vadd.xlane.f32.xlu0 %v70_v18  ;;  %119 = vadd.xlane.f32.xlu1 %v118_v19  ;;  %v142_v51 = vsel %vm57_vm0, %v1437_v49, 0.0  ;;  %v1451_v53 = vld [vmem:[%s1908_s0 + $0xe8] sm:$0xff]  ;;  %v97_v54 = vsel %vm57_vm0, %v1446_v52, 0.0  ;;  %v1465_v57 = vld [vmem:[%s1908_s0 + $0xf0] sm:$0xff]  ;;  %v100_v58 = vsel %vm57_vm0, %v1460_v56, 0.0  ;;  %v1474_v60 = vld [vmem:[%s1908_s0 + $0x78] sm:$0xff] }
  0x14   :  { %v145_v55 = vsel %vm57_vm0, %v1451_v53, 0.0  ;;  %v148_v59 = vsel %vm57_vm0, %v1465_v57, 0.0  ;;  %v1479_v61 = vld [vmem:[%s1908_s0 + $0xf8] sm:$0xff]  ;;  %v103_v62 = vsel %vm57_vm0, %v1474_v60, 0.0 }
  0x15   :  { %v151_v63 = vsel %vm57_vm0, %v1479_v61, 0.0 }
  0x17   :  { %74 = vadd.xlane.f32.xlu0 %v73_v22  ;;  %122 = vadd.xlane.f32.xlu1 %v121_v23 }
  0x1b   :  { %77 = vadd.xlane.f32.xlu0 %v76_v26  ;;  %125 = vadd.xlane.f32.xlu1 %v124_v27 }
  0x1f   :  { %80 = vadd.xlane.f32.xlu0 %v79_v30  ;;  %128 = vadd.xlane.f32.xlu1 %v127_v31 }
  0x23   :  { %83 = vadd.xlane.f32.xlu0 %v82_v34  ;;  %131 = vadd.xlane.f32.xlu1 %v130_v35 }
  0x27   :  { %86 = vadd.xlane.f32.xlu0 %v85_v38  ;;  %134 = vadd.xlane.f32.xlu1 %v133_v39 }
  0x2b   :  { %89 = vadd.xlane.f32.xlu0 %v88_v42  ;;  %137 = vadd.xlane.f32.xlu1 %v136_v43 }
  0x2f   :  { %92 = vadd.xlane.f32.xlu0 %v91_v46  ;;  %140 = vadd.xlane.f32.xlu1 %v139_v47 }
  0x33   :  { %95 = vadd.xlane.f32.xlu0 %v94_v50  ;;  %143 = vadd.xlane.f32.xlu1 %v142_v51 }
  0x37   :  { %98 = vadd.xlane.f32.xlu0 %v97_v54  ;;  %146 = vadd.xlane.f32.xlu1 %v145_v55 }
  0x3b   :  { %101 = vadd.xlane.f32.xlu0 %v100_v58  ;;  %149 = vadd.xlane.f32.xlu1 %v148_v59 }
  0x3f   :  { %104 = vadd.xlane.f32.xlu0 %v103_v62  ;;  %152 = vadd.xlane.f32.xlu1 %v151_v63 }
  0x90   :  { %v60_v3 = vpop.xlane.xlu0 %59  ;;  %v63_v4 = vpop.xlane.xlu1 %62 }
  0x91   :  { %v155_v6 = vmul.f32 0.03125, %v60_v3  ;;  %v156_v7 = vmul.f32 0.03125, %v63_v4 }
  0x93   :  { %v1486_v10 = vsub.f32 %v1264_v0, %v155_v6  ;;  %v1489_v11 = vsub.f32 %v1269_v1, %v156_v7 }
  0x94   :  { %v108_v14 = vpop.xlane.xlu0 %107  ;;  %v111_v15 = vpop.xlane.xlu1 %110 }
  0x95   :  { %v171_v18 = vmul.f32 0.03125, %v108_v14  ;;  %v172_v19 = vmul.f32 0.03125, %v111_v15  ;;  %v219_v22 = vmul.f32 %v1486_v10, %v1486_v10  ;;  %v220_v23 = vmul.f32 %v1489_v11, %v1489_v11 }
  0x97   :  { %v1496_v26 = vsub.f32 %v1274_v2, %v171_v18  ;;  %v1499_v27 = vsub.f32 %v1283_v5, %v172_v19  ;;  %v251_v0 = vsel %vm57_vm0, %v219_v22, 0.0  ;;  %v254_v31 = vsel %vm57_vm0, %v220_v23, 0.0 }
  0x98   :  { %252 = vadd.xlane.f32.xlu0 %v251_v0  ;;  %v66_v1 = vpop.xlane.xlu0 %65  ;;  %v114_v30 = vpop.xlane.xlu1 %113 }
  0x99   :  { %v157_v34 = vmul.f32 0.03125, %v66_v1  ;;  %v173_v35 = vmul.f32 0.03125, %v114_v30  ;;  %v235_v38 = vmul.f32 %v1496_v26, %v1496_v26  ;;  %v236_v39 = vmul.f32 %v1499_v27, %v1499_v27 }
  0x9b   :  { %v1508_v2 = vsub.f32 %v1292_v8, %v157_v34  ;;  %v1511_v5 = vsub.f32 %v1297_v9, %v173_v35  ;;  %v299_v42 = vsel %vm57_vm0, %v235_v38, 0.0  ;;  %v302_v47 = vsel %vm57_vm0, %v236_v39, 0.0 }
  0x9c   :  { %255 = vadd.xlane.f32.xlu0 %v254_v31  ;;  %300 = vadd.xlane.f32.xlu1 %v299_v42  ;;  %v69_v43 = vpop.xlane.xlu0 %68  ;;  %v117_v46 = vpop.xlane.xlu1 %116 }
  0x9d   :  { %v158_v50 = vmul.f32 0.03125, %v69_v43  ;;  %v174_v51 = vmul.f32 0.03125, %v117_v46  ;;  %v221_v54 = vmul.f32 %v1508_v2, %v1508_v2  ;;  %v237_v8 = vmul.f32 %v1511_v5, %v1511_v5 }
  0x9f   :  { %v1520_v55 = vsub.f32 %v1306_v12, %v158_v50  ;;  %v1523_v9 = vsub.f32 %v1311_v13, %v174_v51  ;;  %v257_v58 = vsel %vm57_vm0, %v221_v54, 0.0  ;;  %v305_v63 = vsel %vm57_vm0, %v237_v8, 0.0 }
  0xa0   :  { %303 = vadd.xlane.f32.xlu1 %v302_v47  ;;  %258 = vadd.xlane.f32.xlu0 %v257_v58  ;;  %v72_v59 = vpop.xlane.xlu0 %71  ;;  %v120_v62 = vpop.xlane.xlu1 %119 }
  0xa1   :  { %v159_v3 = vmul.f32 0.03125, %v72_v59  ;;  %v175_v4 = vmul.f32 0.03125, %v120_v62  ;;  %v222_v6 = vmul.f32 %v1520_v55, %v1520_v55  ;;  %v238_v12 = vmul.f32 %v1523_v9, %v1523_v9 }
  0xa3   :  { %v1532_v7 = vsub.f32 %v1320_v16, %v159_v3  ;;  %v1535_v13 = vsub.f32 %v1325_v17, %v175_v4  ;;  %v260_v14 = vsel %vm57_vm0, %v222_v6, 0.0  ;;  %v308_v19 = vsel %vm57_vm0, %v238_v12, 0.0 }
  0xa4   :  { %306 = vadd.xlane.f32.xlu1 %v305_v63  ;;  %261 = vadd.xlane.f32.xlu0 %v260_v14  ;;  %v75_v15 = vpop.xlane.xlu0 %74  ;;  %v123_v18 = vpop.xlane.xlu1 %122 }
  0xa5   :  { %v160_v22 = vmul.f32 0.03125, %v75_v15  ;;  %v176_v23 = vmul.f32 0.03125, %v123_v18  ;;  %v223_v0 = vmul.f32 %v1532_v7, %v1532_v7  ;;  %v239_v16 = vmul.f32 %v1535_v13, %v1535_v13 }
  0xa7   :  { %v1544_v1 = vsub.f32 %v1334_v20, %v160_v22  ;;  %v1547_v17 = vsub.f32 %v1339_v21, %v176_v23  ;;  %v263_v30 = vsel %vm57_vm0, %v223_v0, 0.0  ;;  %v311_v35 = vsel %vm57_vm0, %v239_v16, 0.0 }
  0xa8   :  { %309 = vadd.xlane.f32.xlu1 %v308_v19  ;;  %264 = vadd.xlane.f32.xlu0 %v263_v30  ;;  %v78_v31 = vpop.xlane.xlu0 %77  ;;  %v126_v34 = vpop.xlane.xlu1 %125 }
  0xa9   :  { %v161_v38 = vmul.f32 0.03125, %v78_v31  ;;  %v177_v39 = vmul.f32 0.03125, %v126_v34  ;;  %v224_v42 = vmul.f32 %v1544_v1, %v1544_v1  ;;  %v240_v20 = vmul.f32 %v1547_v17, %v1547_v17 }
  0xab   :  { %v1556_v43 = vsub.f32 %v1348_v24, %v161_v38  ;;  %v1559_v21 = vsub.f32 %v1353_v25, %v177_v39  ;;  %v266_v46 = vsel %vm57_vm0, %v224_v42, 0.0  ;;  %v314_v51 = vsel %vm57_vm0, %v240_v20, 0.0 }
  0xac   :  { %312 = vadd.xlane.f32.xlu1 %v311_v35  ;;  %267 = vadd.xlane.f32.xlu0 %v266_v46  ;;  %v81_v47 = vpop.xlane.xlu0 %80  ;;  %v129_v50 = vpop.xlane.xlu1 %128 }
  0xad   :  { %v162_v54 = vmul.f32 0.03125, %v81_v47  ;;  %v178_v8 = vmul.f32 0.03125, %v129_v50  ;;  %v225_v58 = vmul.f32 %v1556_v43, %v1556_v43  ;;  %v241_v24 = vmul.f32 %v1559_v21, %v1559_v21 }
  0xaf   :  { %v1568_v59 = vsub.f32 %v1362_v28, %v162_v54  ;;  %v1571_v25 = vsub.f32 %v1367_v29, %v178_v8  ;;  %v269_v62 = vsel %vm57_vm0, %v225_v58, 0.0  ;;  %v317_v4 = vsel %vm57_vm0, %v241_v24, 0.0 }
  0xb0   :  { %315 = vadd.xlane.f32.xlu1 %v314_v51  ;;  %270 = vadd.xlane.f32.xlu0 %v269_v62  ;;  %v84_v63 = vpop.xlane.xlu0 %83  ;;  %v132_v3 = vpop.xlane.xlu1 %131 }
  0xb1   :  { %v163_v6 = vmul.f32 0.03125, %v84_v63  ;;  %v179_v12 = vmul.f32 0.03125, %v132_v3  ;;  %v226_v14 = vmul.f32 %v1568_v59, %v1568_v59  ;;  %v242_v28 = vmul.f32 %v1571_v25, %v1571_v25  ;;  %v618_v63 = vld [vmem:[%s1911_s3 + $0x8] sm:$0xff] }
  0xb3   :  { %v1580_v15 = vsub.f32 %v1376_v32, %v163_v6  ;;  %v1583_v29 = vsub.f32 %v1381_v33, %v179_v12  ;;  %v272_v18 = vsel %vm57_vm0, %v226_v14, 0.0  ;;  %v320_v23 = vsel %vm57_vm0, %v242_v28, 0.0 }
  0xb4   :  { %318 = vadd.xlane.f32.xlu1 %v317_v4  ;;  %273 = vadd.xlane.f32.xlu0 %v272_v18  ;;  %v87_v19 = vpop.xlane.xlu0 %86  ;;  %v135_v22 = vpop.xlane.xlu1 %134 }
  0xb5   :  { %v164_v0 = vmul.f32 0.03125, %v87_v19  ;;  %v180_v16 = vmul.f32 0.03125, %v135_v22  ;;  %v227_v30 = vmul.f32 %v1580_v15, %v1580_v15  ;;  %v243_v32 = vmul.f32 %v1583_v29, %v1583_v29 }
  0xb7   :  { %v1592_v31 = vsub.f32 %v1390_v36, %v164_v0  ;;  %v1595_v33 = vsub.f32 %v1395_v37, %v180_v16  ;;  %v275_v34 = vsel %vm57_vm0, %v227_v30, 0.0  ;;  %v323_v39 = vsel %vm57_vm0, %v243_v32, 0.0  ;;  %v620_v0 = vld [vmem:[%s1911_s3 + $0x18] sm:$0xff] }
  0xb8   :  { %321 = vadd.xlane.f32.xlu1 %v320_v23  ;;  %276 = vadd.xlane.f32.xlu0 %v275_v34  ;;  %v90_v35 = vpop.xlane.xlu0 %89  ;;  %v138_v38 = vpop.xlane.xlu1 %137 }
  0xb9   :  { %v165_v42 = vmul.f32 0.03125, %v90_v35  ;;  %v181_v20 = vmul.f32 0.03125, %v138_v38  ;;  %v228_v46 = vmul.f32 %v1592_v31, %v1592_v31  ;;  %v244_v36 = vmul.f32 %v1595_v33, %v1595_v33 }
  0xbb   :  { %v1604_v47 = vsub.f32 %v1404_v40, %v165_v42  ;;  %v1607_v37 = vsub.f32 %v1409_v41, %v181_v20  ;;  %v278_v50 = vsel %vm57_vm0, %v228_v46, 0.0  ;;  %v326_v8 = vsel %vm57_vm0, %v244_v36, 0.0  ;;  %v617_v41 = vld [vmem:[%s1911_s3] sm:$0xff] }
  0xbc   :  { %324 = vadd.xlane.f32.xlu1 %v323_v39  ;;  %279 = vadd.xlane.f32.xlu0 %v278_v50  ;;  %v93_v51 = vpop.xlane.xlu0 %92  ;;  %v141_v54 = vpop.xlane.xlu1 %140  ;;  %v1125_v3 = vpack.c.bf16 %v618_v63, %v617_v41 }
  0xbd   :  { %v166_v58 = vmul.f32 0.03125, %v93_v51  ;;  %v182_v24 = vmul.f32 0.03125, %v141_v54  ;;  %v229_v62 = vmul.f32 %v1604_v47, %v1604_v47  ;;  %v245_v40 = vmul.f32 %v1607_v37, %v1607_v37 }
  0xbe   :  { %1126 = vmatprep.subr.bf16.mxu0 %v1125_v3  ;;  %1133 = vmatprep.subr.bf16.mxu1 %v1125_v3 }
  0xbf   :  { %v1622_v4 = vsub.f32 %v1418_v44, %v166_v58  ;;  %v1625_v6 = vsub.f32 %v1423_v45, %v182_v24  ;;  %v281_v12 = vsel %vm57_vm0, %v229_v62, 0.0  ;;  %v329_v18 = vsel %vm57_vm0, %v245_v40, 0.0  ;;  %v619_v45 = vld [vmem:[%s1911_s3 + $0x10] sm:$0xff]  ;;  %1128 = vmatpush3.bf16.msra.mxu0 %v1125_v3  ;;  %1135 = vmatpush3.bf16.msra.mxu1 %v1125_v3 }
  0xc0   :  { %327 = vadd.xlane.f32.xlu1 %v326_v8  ;;  %282 = vadd.xlane.f32.xlu0 %v281_v12  ;;  %v96_v14 = vpop.xlane.xlu0 %95  ;;  %v144_v28 = vpop.xlane.xlu1 %143  ;;  %v1129_v16 = vpack.c.bf16 %v620_v0, %v619_v45 }
  0xc1   :  { %v167_v19 = vmul.f32 0.03125, %v96_v14  ;;  %v183_v22 = vmul.f32 0.03125, %v144_v28  ;;  %v230_v23 = vmul.f32 %v1622_v4, %v1622_v4  ;;  %v246_v44 = vmul.f32 %v1625_v6, %v1625_v6 }
  0xc2   :  { %1130 = vmatprep.subr.bf16.mxu0 %v1129_v16  ;;  %1134 = vmatprep.subr.bf16.mxu1 %v1129_v16 }
  0xc3   :  { %v1640_v30 = vsub.f32 %v1432_v48, %v167_v19  ;;  %v1643_v32 = vsub.f32 %v1437_v49, %v183_v22  ;;  %v284_v34 = vsel %vm57_vm0, %v230_v23, 0.0  ;;  %v332_v39 = vsel %vm57_vm0, %v246_v44, 0.0  ;;  %1132 = vmatpush3.bf16.msra.mxu0 %v1129_v16  ;;  %1136 = vmatpush3.bf16.msra.mxu1 %v1129_v16 }
  0xc4   :  { %330 = vadd.xlane.f32.xlu1 %v329_v18  ;;  %285 = vadd.xlane.f32.xlu0 %v284_v34  ;;  %v99_v35 = vpop.xlane.xlu0 %98  ;;  %v147_v38 = vpop.xlane.xlu1 %146 }
  0xc5   :  { %v168_v42 = vmul.f32 0.03125, %v99_v35  ;;  %v184_v20 = vmul.f32 0.03125, %v147_v38  ;;  %v231_v46 = vmul.f32 %v1640_v30, %v1640_v30  ;;  %v247_v48 = vmul.f32 %v1643_v32, %v1643_v32 }
  0xc7   :  { %v1652_v49 = vsub.f32 %v1446_v52, %v168_v42  ;;  %v1655_v36 = vsub.f32 %v1451_v53, %v184_v20  ;;  %v287_v50 = vsel %vm57_vm0, %v231_v46, 0.0  ;;  %v335_v8 = vsel %vm57_vm0, %v247_v48, 0.0 }
  0xc8   :  { %333 = vadd.xlane.f32.xlu1 %v332_v39  ;;  %288 = vadd.xlane.f32.xlu0 %v287_v50  ;;  %v102_v51 = vpop.xlane.xlu0 %101  ;;  %v150_v54 = vpop.xlane.xlu1 %149 }
  0xc9   :  { %v169_v58 = vmul.f32 0.03125, %v102_v51  ;;  %v185_v24 = vmul.f32 0.03125, %v150_v54  ;;  %v232_v62 = vmul.f32 %v1652_v49, %v1652_v49  ;;  %v248_v52 = vmul.f32 %v1655_v36, %v1655_v36 }
  0xcb   :  { %v1664_v40 = vsub.f32 %v1460_v56, %v169_v58  ;;  %v1667_v53 = vsub.f32 %v1465_v57, %v185_v24  ;;  %v290_v41 = vsel %vm57_vm0, %v232_v62, 0.0  ;;  %v338_v12 = vsel %vm57_vm0, %v248_v52, 0.0 }
  0xcc   :  { %336 = vadd.xlane.f32.xlu1 %v335_v8  ;;  %291 = vadd.xlane.f32.xlu0 %v290_v41  ;;  %v105_v63 = vpop.xlane.xlu0 %104  ;;  %v153_v3 = vpop.xlane.xlu1 %152 }
  0xcd   :  { %v170_v14 = vmul.f32 0.03125, %v105_v63  ;;  %v186_v28 = vmul.f32 0.03125, %v153_v3  ;;  %v233_v18 = vmul.f32 %v1664_v40, %v1664_v40  ;;  %v249_v56 = vmul.f32 %v1667_v53, %v1667_v53  ;;  %v1692_v3 = vld [vmem:[%s1909_s1] ss:$0 sm:$0xff] }
  0xcf   :  { %v1676_v19 = vsub.f32 %v1474_v60, %v170_v14  ;;  %v1679_v57 = vsub.f32 %v1479_v61, %v186_v28  ;;  %v293_v22 = vsel %vm57_vm0, %v233_v18, 0.0  ;;  %v341_v23 = vsel %vm57_vm0, %v249_v56, 0.0 }
  0xd0   :  { %339 = vadd.xlane.f32.xlu1 %v338_v12  ;;  %294 = vadd.xlane.f32.xlu0 %v293_v22  ;;  %v1698_v22 = vld [vmem:[%s1910_s2] ss:$0 sm:$0xff] }
  0xd1   :  { %v234_v44 = vmul.f32 %v1676_v19, %v1676_v19  ;;  %v250_v45 = vmul.f32 %v1679_v57, %v1679_v57 }
  0xd3   :  { %v296_v0 = vsel %vm57_vm0, %v234_v44, 0.0  ;;  %v344_v60 = vsel %vm57_vm0, %v250_v45, 0.0 }
  0xd4   :  { %342 = vadd.xlane.f32.xlu1 %v341_v23  ;;  %297 = vadd.xlane.f32.xlu0 %v296_v0 }
  0xd8   :  { %345 = vadd.xlane.f32.xlu1 %v344_v60 }
 0x125   :  { %v253_v61 = vpop.xlane.xlu0 %252 }
 0x126   :  { %v347_v16 = vmul.f32 0.03125, %v253_v61 }
 0x128   :  { %v379_v34 = vadd.f32 1e-05, %v347_v16 }
 0x129   :  { %v301_v35 = vpop.xlane.xlu1 %300  ;;  %v256_v38 = vpop.xlane.xlu0 %255 }
 0x12a   :  { %1140 = vrsqrt.f32 %v379_v34  ;;  %v363_v39 = vmul.f32 0.03125, %v301_v35  ;;  %v348_v42 = vmul.f32 0.03125, %v256_v38 }
 0x12c   :  { %v395_v20 = vadd.f32 1e-05, %v363_v39  ;;  %v380_v46 = vadd.f32 1e-05, %v348_v42 }
 0x12d   :  { %v304_v48 = vpop.xlane.xlu1 %303  ;;  %v259_v50 = vpop.xlane.xlu0 %258 }
 0x12e   :  { %1142 = vrsqrt.f32 %v395_v20  ;;  %v364_v51 = vmul.f32 0.03125, %v304_v48  ;;  %v349_v54 = vmul.f32 0.03125, %v259_v50 }
 0x12f   :  { %1144 = vrsqrt.f32 %v380_v46 }
 0x130   :  { %v396_v8 = vadd.f32 1e-05, %v364_v51  ;;  %v381_v58 = vadd.f32 1e-05, %v349_v54 }
 0x131   :  { %v307_v24 = vpop.xlane.xlu1 %306  ;;  %v262_v62 = vpop.xlane.xlu0 %261 }
 0x132   :  { %1146 = vrsqrt.f32 %v396_v8  ;;  %v365_v52 = vmul.f32 0.03125, %v307_v24  ;;  %v350_v41 = vmul.f32 0.03125, %v262_v62 }
 0x133   :  { %1148 = vrsqrt.f32 %v381_v58 }
 0x134   :  { %v1141_v63 = vpop.eup %1140  ;;  %v397_v12 = vadd.f32 1e-05, %v365_v52  ;;  %v382_v14 = vadd.f32 1e-05, %v350_v41 }
 0x135   :  { %v443_v28 = vmul.f32 %v1141_v63, %v1486_v10  ;;  %v310_v18 = vpop.xlane.xlu1 %309  ;;  %v265_v56 = vpop.xlane.xlu0 %264 }
 0x136   :  { %1150 = vrsqrt.f32 %v397_v12  ;;  %v366_v23 = vmul.f32 0.03125, %v310_v18  ;;  %v351_v44 = vmul.f32 0.03125, %v265_v56 }
 0x137   :  { %v482_v45 = vmul.f32 %v1692_v3, %v443_v28  ;;  %1152 = vrsqrt.f32 %v382_v14 }
 0x138   :  { %v1143_v0 = vpop.eup %1142  ;;  %v398_v60 = vadd.f32 1e-05, %v366_v23  ;;  %v383_v61 = vadd.f32 1e-05, %v351_v44 }
 0x139   :  { %v1145_v16 = vpop.eup %1144  ;;  %v521_v34 = vadd.f32 %v1698_v22, %v482_v45  ;;  %v459_v10 = vmul.f32 %v1143_v0, %v1496_v26  ;;  %v313_v35 = vpop.xlane.xlu1 %312 }
 0x13a   :  { %v268_v38 = vpop.xlane.xlu0 %267  ;;  %v444_v39 = vmul.f32 %v1145_v16, %v1489_v11  ;;  %1154 = vrsqrt.f32 %v398_v60  ;;  %v367_v42 = vmul.f32 0.03125, %v313_v35 }
 0x13b   :  { %v352_v20 = vmul.f32 0.03125, %v268_v38  ;;  %553 = vst.msk [vmem:[#allocation2] sm:$0xff] %vm57_vm0, %v521_v34  ;;  %v498_v46 = vmul.f32 %v1692_v3, %v459_v10  ;;  %1156 = vrsqrt.f32 %v383_v61 }
 0x13c   :  { %v1147_v48 = vpop.eup %1146  ;;  %v483_v50 = vmul.f32 %v1692_v3, %v444_v39  ;;  %v399_v51 = vadd.f32 1e-05, %v367_v42 }
 0x13d   :  { %v384_v54 = vadd.f32 1e-05, %v352_v20  ;;  %v1149_v8 = vpop.eup %1148  ;;  %v537_v26 = vadd.f32 %v1698_v22, %v498_v46  ;;  %v460_v58 = vmul.f32 %v1147_v48, %v1499_v27  ;;  %v316_v24 = vpop.xlane.xlu1 %315 }
 0x13e   :  { %v271_v11 = vpop.xlane.xlu0 %270  ;;  %v522_v62 = vadd.f32 %v1698_v22, %v483_v50  ;;  %v445_v52 = vmul.f32 %v1149_v8, %v1508_v2  ;;  %1158 = vrsqrt.f32 %v399_v51  ;;  %v368_v41 = vmul.f32 0.03125, %v316_v24 }
 0x13f   :  { %569 = vst.msk [vmem:[#allocation2 + $0x80] sm:$0xff] %vm57_vm0, %v537_v26  ;;  %v499_v63 = vmul.f32 %v1692_v3, %v460_v58  ;;  %1160 = vrsqrt.f32 %v384_v54  ;;  %v353_v12 = vmul.f32 0.03125, %v271_v11 }
 0x140   :  { %v1151_v14 = vpop.eup %1150  ;;  %554 = vst.msk [vmem:[#allocation2 + $0x8] sm:$0xff] %vm57_vm0, %v522_v62  ;;  %v484_v28 = vmul.f32 %v1692_v3, %v445_v52  ;;  %v400_v27 = vadd.f32 1e-05, %v368_v41 }
 0x141   :  { %v1153_v18 = vpop.eup %1152  ;;  %v538_v56 = vadd.f32 %v1698_v22, %v499_v63  ;;  %v461_v23 = vmul.f32 %v1151_v14, %v1511_v5  ;;  %v385_v2 = vadd.f32 1e-05, %v353_v12  ;;  %v319_v44 = vpop.xlane.xlu1 %318 }
 0x142   :  { %v274_v45 = vpop.xlane.xlu0 %273  ;;  %v523_v0 = vadd.f32 %v1698_v22, %v484_v28  ;;  %v446_v60 = vmul.f32 %v1153_v18, %v1520_v55  ;;  %1162 = vrsqrt.f32 %v400_v27  ;;  %v369_v61 = vmul.f32 0.03125, %v319_v44  ;;  %v585_v16 = vld [vmem:[#allocation2] sm:$0xff] }
 0x143   :  { %570 = vst.msk [vmem:[#allocation2 + $0x88] sm:$0xff] %vm57_vm0, %v538_v56  ;;  %v500_v34 = vmul.f32 %v1692_v3, %v461_v23  ;;  %1164 = vrsqrt.f32 %v385_v2  ;;  %v354_v10 = vmul.f32 0.03125, %v274_v45  ;;  %1077 = vmatprep.mubr.msk.f32.mxu0 %vm57_vm0, %v585_v16 }
 0x144   :  { %v1155_v35 = vpop.eup %1154  ;;  %555 = vst.msk [vmem:[#allocation2 + $0x10] sm:$0xff] %vm57_vm0, %v523_v0  ;;  %v485_v5 = vmul.f32 %v1692_v3, %v446_v60  ;;  %v401_v38 = vadd.f32 1e-05, %v369_v61 }
 0x145   :  { %v1157_v39 = vpop.eup %1156  ;;  %v539_v55 = vadd.f32 %v1698_v22, %v500_v34  ;;  %v462_v42 = vmul.f32 %v1155_v35, %v1523_v9  ;;  %v386_v20 = vadd.f32 1e-05, %v354_v10  ;;  %v322_v46 = vpop.xlane.xlu1 %321 }
 0x146   :  { %v277_v48 = vpop.xlane.xlu0 %276  ;;  %v524_v50 = vadd.f32 %v1698_v22, %v485_v5  ;;  %v447_v51 = vmul.f32 %v1157_v39, %v1532_v7  ;;  %1166 = vrsqrt.f32 %v401_v38  ;;  %v370_v54 = vmul.f32 0.03125, %v322_v46  ;;  %v601_v8 = vld [vmem:[#allocation2 + $0x80] sm:$0xff] }
 0x147   :  { %571 = vst.msk [vmem:[#allocation2 + $0x90] sm:$0xff] %vm57_vm0, %v539_v55  ;;  %v501_v26 = vmul.f32 %v1692_v3, %v462_v42  ;;  %1168 = vrsqrt.f32 %v386_v20  ;;  %v355_v58 = vmul.f32 0.03125, %v277_v48  ;;  %v586_v24 = vld [vmem:[#allocation2 + $0x8] sm:$0xff]  ;;  %1101 = vmatprep.mubr.msk.f32.mxu1 %vm57_vm0, %v601_v8 }
 0x148   :  { %v1159_v9 = vpop.eup %1158  ;;  %556 = vst.msk [vmem:[#allocation2 + $0x18] sm:$0xff] %vm57_vm0, %v524_v50  ;;  %v486_v11 = vmul.f32 %v1692_v3, %v447_v51  ;;  %v402_v62 = vadd.f32 1e-05, %v370_v54  ;;  %1078 = vmatmul.mubr.msk.f32.vlgmr.msra.gmra.mrb[0].mxu0 %vm57_vm0, %v586_v24 }
 0x149   :  { %v1161_v7 = vpop.eup %1160  ;;  %v540_v52 = vadd.f32 %v1698_v22, %v501_v26  ;;  %v463_v41 = vmul.f32 %v1159_v9, %v1535_v13  ;;  %v387_v63 = vadd.f32 1e-05, %v355_v58  ;;  %v325_v12 = vpop.xlane.xlu1 %324 }
 0x14a   :  { %v280_v14 = vpop.xlane.xlu0 %279  ;;  %v525_v28 = vadd.f32 %v1698_v22, %v486_v11  ;;  %v448_v27 = vmul.f32 %v1161_v7, %v1544_v1  ;;  %1170 = vrsqrt.f32 %v402_v62  ;;  %v371_v18 = vmul.f32 0.03125, %v325_v12  ;;  %v602_v56 = vld [vmem:[#allocation2 + $0x88] sm:$0xff] }
 0x14b   :  { %572 = vst.msk [vmem:[#allocation2 + $0x98] sm:$0xff] %vm57_vm0, %v540_v52  ;;  %v502_v23 = vmul.f32 %v1692_v3, %v463_v41  ;;  %1172 = vrsqrt.f32 %v387_v63  ;;  %v356_v2 = vmul.f32 0.03125, %v280_v14  ;;  %v587_v44 = vld [vmem:[#allocation2 + $0x10] sm:$0xff]  ;;  %1102 = vmatmul.mubr.msk.f32.vlgmr.msra.gmra.mrb[0].mxu1 %vm57_vm0, %v602_v56 }
 0x14c   :  { %v1163_v13 = vpop.eup %1162  ;;  %557 = vst.msk [vmem:[#allocation2 + $0x20] sm:$0xff] %vm57_vm0, %v525_v28  ;;  %v487_v45 = vmul.f32 %v1692_v3, %v448_v27  ;;  %v403_v0 = vadd.f32 1e-05, %v371_v18  ;;  %1080 = vmatprep.mubr.msk.f32.mxu0 %vm57_vm0, %v587_v44 }
 0x14d   :  { %v1165_v1 = vpop.eup %1164  ;;  %v541_v60 = vadd.f32 %v1698_v22, %v502_v23  ;;  %v464_v61 = vmul.f32 %v1163_v13, %v1547_v17  ;;  %v388_v16 = vadd.f32 1e-05, %v356_v2  ;;  %v328_v34 = vpop.xlane.xlu1 %327 }
 0x14e   :  { %v283_v10 = vpop.xlane.xlu0 %282  ;;  %v526_v35 = vadd.f32 %v1698_v22, %v487_v45  ;;  %v449_v5 = vmul.f32 %v1165_v1, %v1556_v43  ;;  %1174 = vrsqrt.f32 %v403_v0  ;;  %v372_v38 = vmul.f32 0.03125, %v328_v34  ;;  %v603_v39 = vld [vmem:[#allocation2 + $0x90] sm:$0xff] }
 0x14f   :  { %573 = vst.msk [vmem:[#allocation2 + $0xa0] sm:$0xff] %vm57_vm0, %v541_v60  ;;  %v503_v55 = vmul.f32 %v1692_v3, %v464_v61  ;;  %1176 = vrsqrt.f32 %v388_v16  ;;  %v357_v42 = vmul.f32 0.03125, %v283_v10  ;;  %v588_v20 = vld [vmem:[#allocation2 + $0x18] sm:$0xff]  ;;  %1104 = vmatprep.mubr.msk.f32.mxu1 %vm57_vm0, %v603_v39 }
 0x150   :  { %v1167_v17 = vpop.eup %1166  ;;  %558 = vst.msk [vmem:[#allocation2 + $0x28] sm:$0xff] %vm57_vm0, %v526_v35  ;;  %v488_v46 = vmul.f32 %v1692_v3, %v449_v5  ;;  %v404_v48 = vadd.f32 1e-05, %v372_v38  ;;  %1081 = vmatmul.mubr.msk.f32.gmra.mrb[2].mxu0 %vm57_vm0, %v588_v20 }
 0x151   :  { %v1169_v43 = vpop.eup %1168  ;;  %v542_v50 = vadd.f32 %v1698_v22, %v503_v55  ;;  %v465_v51 = vmul.f32 %v1167_v17, %v1559_v21  ;;  %v389_v54 = vadd.f32 1e-05, %v357_v42  ;;  %v331_v8 = vpop.xlane.xlu1 %330 }
 0x152   :  { %v286_v26 = vpop.xlane.xlu0 %285  ;;  %v527_v58 = vadd.f32 %v1698_v22, %v488_v46  ;;  %v450_v24 = vmul.f32 %v1169_v43, %v1568_v59  ;;  %1178 = vrsqrt.f32 %v404_v48  ;;  %v373_v9 = vmul.f32 0.03125, %v331_v8  ;;  %v604_v11 = vld [vmem:[#allocation2 + $0x98] sm:$0xff] }
 0x153   :  { %574 = vst.msk [vmem:[#allocation2 + $0xa8] sm:$0xff] %vm57_vm0, %v542_v50  ;;  %v504_v62 = vmul.f32 %v1692_v3, %v465_v51  ;;  %1180 = vrsqrt.f32 %v389_v54  ;;  %v358_v7 = vmul.f32 0.03125, %v286_v26  ;;  %v589_v52 = vld [vmem:[#allocation2 + $0x20] sm:$0xff]  ;;  %1105 = vmatmul.mubr.msk.f32.gmra.mrb[2].mxu1 %vm57_vm0, %v604_v11 }
 0x154   :  { %v1171_v21 = vpop.eup %1170  ;;  %559 = vst.msk [vmem:[#allocation2 + $0x30] sm:$0xff] %vm57_vm0, %v527_v58  ;;  %v489_v41 = vmul.f32 %v1692_v3, %v450_v24  ;;  %v405_v63 = vadd.f32 1e-05, %v373_v9  ;;  %1083 = vmatprep.mubr.msk.f32.mxu0 %vm57_vm0, %v589_v52 }
 0x155   :  { %v1173_v59 = vpop.eup %1172  ;;  %v543_v12 = vadd.f32 %v1698_v22, %v504_v62  ;;  %v466_v14 = vmul.f32 %v1171_v21, %v1571_v25  ;;  %v390_v28 = vadd.f32 1e-05, %v358_v7  ;;  %v334_v27 = vpop.xlane.xlu1 %333 }
 0x156   :  { %v289_v18 = vpop.xlane.xlu0 %288  ;;  %v528_v56 = vadd.f32 %v1698_v22, %v489_v41  ;;  %v451_v23 = vmul.f32 %v1173_v59, %v1580_v15  ;;  %1182 = vrsqrt.f32 %v405_v63  ;;  %v374_v2 = vmul.f32 0.03125, %v334_v27  ;;  %v605_v44 = vld [vmem:[#allocation2 + $0xa0] sm:$0xff] }
 0x157   :  { %575 = vst.msk [vmem:[#allocation2 + $0xb0] sm:$0xff] %vm57_vm0, %v543_v12  ;;  %v505_v13 = vmul.f32 %v1692_v3, %v466_v14  ;;  %1184 = vrsqrt.f32 %v390_v28  ;;  %v359_v45 = vmul.f32 0.03125, %v289_v18  ;;  %v590_v0 = vld [vmem:[#allocation2 + $0x28] sm:$0xff]  ;;  %1107 = vmatprep.mubr.msk.f32.mxu1 %vm57_vm0, %v605_v44 }
 0x158   :  { %v1175_v25 = vpop.eup %1174  ;;  %560 = vst.msk [vmem:[#allocation2 + $0x38] sm:$0xff] %vm57_vm0, %v528_v56  ;;  %v490_v1 = vmul.f32 %v1692_v3, %v451_v23  ;;  %v406_v60 = vadd.f32 1e-05, %v374_v2  ;;  %1084 = vmatmul.mubr.msk.f32.gmra.mrb[4].mxu0 %vm57_vm0, %v590_v0 }
 0x159   :  { %v1177_v15 = vpop.eup %1176  ;;  %v544_v61 = vadd.f32 %v1698_v22, %v505_v13  ;;  %v467_v16 = vmul.f32 %v1175_v25, %v1583_v29  ;;  %v391_v34 = vadd.f32 1e-05, %v359_v45  ;;  %v337_v10 = vpop.xlane.xlu1 %336 }
 0x15a   :  { %v292_v35 = vpop.xlane.xlu0 %291  ;;  %v529_v5 = vadd.f32 %v1698_v22, %v490_v1  ;;  %v452_v38 = vmul.f32 %v1177_v15, %v1592_v31  ;;  %1186 = vrsqrt.f32 %v406_v60  ;;  %v375_v39 = vmul.f32 0.03125, %v337_v10  ;;  %v606_v55 = vld [vmem:[#allocation2 + $0xa8] sm:$0xff] }
 0x15b   :  { %576 = vst.msk [vmem:[#allocation2 + $0xb8] sm:$0xff] %vm57_vm0, %v544_v61  ;;  %v506_v42 = vmul.f32 %v1692_v3, %v467_v16  ;;  %1188 = vrsqrt.f32 %v391_v34  ;;  %v360_v20 = vmul.f32 0.03125, %v292_v35  ;;  %v591_v17 = vld [vmem:[#allocation2 + $0x30] sm:$0xff]  ;;  %1108 = vmatmul.mubr.msk.f32.gmra.mrb[4].mxu1 %vm57_vm0, %v606_v55 }
 0x15c   :  { %v1179_v29 = vpop.eup %1178  ;;  %561 = vst.msk [vmem:[#allocation2 + $0x40] sm:$0xff] %vm57_vm0, %v529_v5  ;;  %v491_v46 = vmul.f32 %v1692_v3, %v452_v38  ;;  %v407_v48 = vadd.f32 1e-05, %v375_v39  ;;  %1086 = vmatprep.mubr.msk.f32.mxu0 %vm57_vm0, %v591_v17 }
 0x15d   :  { %v1181_v31 = vpop.eup %1180  ;;  %v545_v43 = vadd.f32 %v1698_v22, %v506_v42  ;;  %v468_v50 = vmul.f32 %v1179_v29, %v1595_v33  ;;  %v392_v51 = vadd.f32 1e-05, %v360_v20  ;;  %v340_v54 = vpop.xlane.xlu1 %339 }
 0x15e   :  { %v295_v8 = vpop.xlane.xlu0 %294  ;;  %v530_v26 = vadd.f32 %v1698_v22, %v491_v46  ;;  %v453_v58 = vmul.f32 %v1181_v31, %v1604_v47  ;;  %1190 = vrsqrt.f32 %v407_v48  ;;  %v376_v24 = vmul.f32 0.03125, %v340_v54  ;;  %v607_v9 = vld [vmem:[#allocation2 + $0xb0] sm:$0xff] }
 0x15f   :  { %577 = vst.msk [vmem:[#allocation2 + $0xc0] sm:$0xff] %vm57_vm0, %v545_v43  ;;  %v507_v11 = vmul.f32 %v1692_v3, %v468_v50  ;;  %1192 = vrsqrt.f32 %v392_v51  ;;  %v361_v62 = vmul.f32 0.03125, %v295_v8  ;;  %v592_v7 = vld [vmem:[#allocation2 + $0x38] sm:$0xff]  ;;  %1110 = vmatprep.mubr.msk.f32.mxu1 %vm57_vm0, %v607_v9 }
 0x160   :  { %v1183_v33 = vpop.eup %1182  ;;  %562 = vst.msk [vmem:[#allocation2 + $0x48] sm:$0xff] %vm57_vm0, %v530_v26  ;;  %v492_v52 = vmul.f32 %v1692_v3, %v453_v58  ;;  %v408_v21 = vadd.f32 1e-05, %v376_v24  ;;  %1087 = vmatmul.mubr.msk.f32.gmra.mrb[6].mxu0 %vm57_vm0, %v592_v7 }
 0x161   :  { %v1185_v47 = vpop.eup %1184  ;;  %v546_v41 = vadd.f32 %v1698_v22, %v507_v11  ;;  %v469_v63 = vmul.f32 %v1183_v33, %v1607_v37  ;;  %v393_v59 = vadd.f32 1e-05, %v361_v62  ;;  %v343_v12 = vpop.xlane.xlu1 %342 }
 0x162   :  { %v298_v14 = vpop.xlane.xlu0 %297  ;;  %v531_v28 = vadd.f32 %v1698_v22, %v492_v52  ;;  %v454_v27 = vmul.f32 %v1185_v47, %v1622_v4  ;;  %1194 = vrsqrt.f32 %v408_v21  ;;  %v377_v18 = vmul.f32 0.03125, %v343_v12  ;;  %v608_v56 = vld [vmem:[#allocation2 + $0xb8] sm:$0xff] }
 0x163   :  { %578 = vst.msk [vmem:[#allocation2 + $0xc8] sm:$0xff] %vm57_vm0, %v546_v41  ;;  %v508_v23 = vmul.f32 %v1692_v3, %v469_v63  ;;  %1196 = vrsqrt.f32 %v393_v59  ;;  %v362_v2 = vmul.f32 0.03125, %v298_v14  ;;  %v593_v44 = vld [vmem:[#allocation2 + $0x40] sm:$0xff]  ;;  %1111 = vmatmul.mubr.msk.f32.gmra.mrb[6].mxu1 %vm57_vm0, %v608_v56 }
 0x164   :  { %v1187_v37 = vpop.eup %1186  ;;  %563 = vst.msk [vmem:[#allocation2 + $0x50] sm:$0xff] %vm57_vm0, %v531_v28  ;;  %v493_v13 = vmul.f32 %v1692_v3, %v454_v27  ;;  %v409_v45 = vadd.f32 1e-05, %v377_v18  ;;  %1089 = vmatprep.mubr.msk.f32.mxu0 %vm57_vm0, %v593_v44 }
 0x165   :  { %v1189_v4 = vpop.eup %1188  ;;  %v547_v0 = vadd.f32 %v1698_v22, %v508_v23  ;;  %v470_v25 = vmul.f32 %v1187_v37, %v1625_v6  ;;  %v394_v1 = vadd.f32 1e-05, %v362_v2  ;;  %v346_v60 = vpop.xlane.xlu1 %345 }
 0x166   :  { %v532_v15 = vadd.f32 %v1698_v22, %v493_v13  ;;  %v455_v61 = vmul.f32 %v1189_v4, %v1640_v30  ;;  %1198 = vrsqrt.f32 %v409_v45  ;;  %v378_v16 = vmul.f32 0.03125, %v346_v60  ;;  %v609_v34 = vld [vmem:[#allocation2 + $0xc0] sm:$0xff] }
 0x167   :  { %579 = vst.msk [vmem:[#allocation2 + $0xd0] sm:$0xff] %vm57_vm0, %v547_v0  ;;  %v509_v10 = vmul.f32 %v1692_v3, %v470_v25  ;;  %1200 = vrsqrt.f32 %v394_v1  ;;  %v594_v35 = vld [vmem:[#allocation2 + $0x48] sm:$0xff]  ;;  %1113 = vmatprep.mubr.msk.f32.mxu1 %vm57_vm0, %v609_v34 }
 0x168   :  { %v1191_v5 = vpop.eup %1190  ;;  %564 = vst.msk [vmem:[#allocation2 + $0x58] sm:$0xff] %vm57_vm0, %v532_v15  ;;  %v494_v6 = vmul.f32 %v1692_v3, %v455_v61  ;;  %v410_v38 = vadd.f32 1e-05, %v378_v16  ;;  %1090 = vmatmul.mubr.msk.f32.gmra.mrb[8].mxu0 %vm57_vm0, %v594_v35 }
 0x169   :  { %v1193_v30 = vpop.eup %1192  ;;  %v548_v39 = vadd.f32 %v1698_v22, %v509_v10  ;;  %v471_v55 = vmul.f32 %v1191_v5, %v1643_v32 }
 0x16a   :  { %v533_v42 = vadd.f32 %v1698_v22, %v494_v6  ;;  %v456_v20 = vmul.f32 %v1193_v30, %v1652_v49  ;;  %1202 = vrsqrt.f32 %v410_v38  ;;  %v610_v17 = vld [vmem:[#allocation2 + $0xc8] sm:$0xff] }
 0x16b   :  { %580 = vst.msk [vmem:[#allocation2 + $0xd8] sm:$0xff] %vm57_vm0, %v548_v39  ;;  %v510_v29 = vmul.f32 %v1692_v3, %v471_v55  ;;  %v595_v46 = vld [vmem:[#allocation2 + $0x50] sm:$0xff]  ;;  %1114 = vmatmul.mubr.msk.f32.gmra.mrb[8].mxu1 %vm57_vm0, %v610_v17 }
 0x16c   :  { %v1195_v48 = vpop.eup %1194  ;;  %565 = vst.msk [vmem:[#allocation2 + $0x60] sm:$0xff] %vm57_vm0, %v533_v42  ;;  %v495_v31 = vmul.f32 %v1692_v3, %v456_v20  ;;  %1092 = vmatprep.mubr.msk.f32.mxu0 %vm57_vm0, %v595_v46 }
 0x16d   :  { %v1197_v32 = vpop.eup %1196  ;;  %v549_v43 = vadd.f32 %v1698_v22, %v510_v29  ;;  %v472_v49 = vmul.f32 %v1195_v48, %v1655_v36 }
 0x16e   :  { %v534_v50 = vadd.f32 %v1698_v22, %v495_v31  ;;  %v457_v51 = vmul.f32 %v1197_v32, %v1664_v40  ;;  %v611_v54 = vld [vmem:[#allocation2 + $0xd0] sm:$0xff] }
 0x16f   :  { %581 = vst.msk [vmem:[#allocation2 + $0xe0] sm:$0xff] %vm57_vm0, %v549_v43  ;;  %v511_v8 = vmul.f32 %v1692_v3, %v472_v49  ;;  %v596_v26 = vld [vmem:[#allocation2 + $0x58] sm:$0xff]  ;;  %1116 = vmatprep.mubr.msk.f32.mxu1 %vm57_vm0, %v611_v54 }
 0x170   :  { %v1199_v58 = vpop.eup %1198  ;;  %566 = vst.msk [vmem:[#allocation2 + $0x68] sm:$0xff] %vm57_vm0, %v534_v50  ;;  %v496_v24 = vmul.f32 %v1692_v3, %v457_v51  ;;  %1093 = vmatmul.mubr.msk.f32.gmra.mrb[10].mxu0 %vm57_vm0, %v596_v26 }
 0x171   :  { %v1201_v36 = vpop.eup %1200  ;;  %v550_v9 = vadd.f32 %v1698_v22, %v511_v8  ;;  %v473_v40 = vmul.f32 %v1199_v58, %v1667_v53 }
 0x172   :  { %v535_v11 = vadd.f32 %v1698_v22, %v496_v24  ;;  %v458_v62 = vmul.f32 %v1201_v36, %v1676_v19  ;;  %v612_v7 = vld [vmem:[#allocation2 + $0xd8] sm:$0xff] }
 0x173   :  { %582 = vst.msk [vmem:[#allocation2 + $0xe8] sm:$0xff] %vm57_vm0, %v550_v9  ;;  %v512_v33 = vmul.f32 %v1692_v3, %v473_v40  ;;  %v597_v52 = vld [vmem:[#allocation2 + $0x60] sm:$0xff]  ;;  %1117 = vmatmul.mubr.msk.f32.gmra.mrb[10].mxu1 %vm57_vm0, %v612_v7 }
 0x174   :  { %v1203_v21 = vpop.eup %1202  ;;  %567 = vst.msk [vmem:[#allocation2 + $0x70] sm:$0xff] %vm57_vm0, %v535_v11  ;;  %v497_v47 = vmul.f32 %v1692_v3, %v458_v62  ;;  %1095 = vmatprep.mubr.msk.f32.mxu0 %vm57_vm0, %v597_v52 }
 0x175   :  { %v551_v53 = vadd.f32 %v1698_v22, %v512_v33  ;;  %v474_v41 = vmul.f32 %v1203_v21, %v1679_v57 }
 0x176   :  { %v536_v19 = vadd.f32 %v1698_v22, %v497_v47  ;;  %v613_v63 = vld [vmem:[#allocation2 + $0xe0] sm:$0xff] }
 0x177   :  { %583 = vst.msk [vmem:[#allocation2 + $0xf0] sm:$0xff] %vm57_vm0, %v551_v53  ;;  %v513_v59 = vmul.f32 %v1692_v3, %v474_v41  ;;  %v598_v12 = vld [vmem:[#allocation2 + $0x68] sm:$0xff]  ;;  %1119 = vmatprep.mubr.msk.f32.mxu1 %vm57_vm0, %v613_v63 }
 0x178   :  { %568 = vst.msk [vmem:[#allocation2 + $0x78] sm:$0xff] %vm57_vm0, %v536_v19  ;;  %1096 = vmatmul.mubr.msk.f32.gmra.mrb[12].mxu0 %vm57_vm0, %v598_v12 }
 0x179   :  { %v552_v14 = vadd.f32 %v1698_v22, %v513_v59  ;;  %v1862_v22 = vld [vmem:[%s1912_s4] ss:$0 sm:$0xff]  ;;  %s1228_s4 = smov [#allocation3]  }
 0x17a   :  { %v614_v28 = vld [vmem:[#allocation2 + $0xe8] sm:$0xff]  ;;  %s987_s17 = sshll.u32 %s1228_s4, 4  ;;  %s988_s17 = int_to_ptr.vmem [resolvable:$true] %s987_s17 }
 0x17b   :  { %584 = vst.msk [vmem:[#allocation2 + $0xf8] sm:$0xff] %vm57_vm0, %v552_v14  ;;  %v599_v57 = vld [vmem:[#allocation2 + $0x70] sm:$0xff]  ;;  %1120 = vmatmul.mubr.msk.f32.gmra.mrb[12].mxu1 %vm57_vm0, %v614_v28  ;;  %s1204_s18 = scalar_lea.vmem %s988_s17, 4096  ;;  %p1209_p1 = scmp.lt.s32.totalorder %s988_s17, %s988_s17 }
 0x17c   :  { %1098 = vmatprep.mubr.msk.f32.mxu0 %vm57_vm0, %v599_v57  ;;  %p1205_p0 = scmp.ne.s32.totalorder %s988_s17, %s1204_s18  ;;  %p1210_p2 = scmp.lt.s32.totalorder %s1204_s18, %s1204_s18 }
 0x17e   :  { %v615_v27 = vld [vmem:[#allocation2 + $0xf0] sm:$0xff]  ;;  %p1211_p3 = por %p1210_p2, %p1209_p1 }
 0x17f   :  { %v600_v18 = vld [vmem:[#allocation2 + $0x78] sm:$0xff]  ;;  %1122 = vmatprep.mubr.msk.f32.mxu1 %vm57_vm0, %v615_v27 }
 0x180   :  { %1099 = vmatmul.mubr.msk.f32.gmra.mrb[14].mxu0 %vm57_vm0, %v600_v18  ;;  %p1212_p4 = pnand %p1211_p3, %p1205_p0 }
 0x182   :  { %v616_v3 = vld [vmem:[#allocation2 + $0xf8] sm:$0xff] }
 0x183   :  { %1123 = vmatmul.mubr.msk.f32.gmra.mrb[14].mxu1 %vm57_vm0, %v616_v3 }
 0x21b   :  { %v1079_v56 = vpop.f32.mrb[0].mxu0 }
 0x21c   :  { %v797_v23 = vadd.f32 %v1079_v56, %v1862_v22  ;;  %v791_v2 = vpop.f32.mrb[1].mxu0 }
 0x21d   :  { %v792_v44 = vadd.f32 %v1862_v22, %v791_v2 }
 0x21e   :  { %951 = vst [vmem:[#allocation3 + $0x8] sm:$0xff] %v797_v23  ;;  %v1103_v37 = vpop.f32.mrb[0].mxu1 }
 0x21f   :  { %950 = vst [vmem:[#allocation3] sm:$0xff] %v792_v44  ;;  %v877_v13 = vadd.f32 %v1103_v37, %v1862_v22  ;;  %v871_v45 = vpop.f32.mrb[1].mxu1 }
 0x220   :  { %v872_v4 = vadd.f32 %v1862_v22, %v871_v45 }
 0x221   :  { %967 = vst [vmem:[#allocation3 + $0x88] sm:$0xff] %v877_v13 }
 0x222   :  { %966 = vst [vmem:[#allocation3 + $0x80] sm:$0xff] %v872_v4 }
 0x223   :  { %v1082_v0 = vpop.f32.mrb[2].mxu0 }
 0x224   :  { %v807_v25 = vadd.f32 %v1082_v0, %v1862_v22  ;;  %v801_v1 = vpop.f32.mrb[3].mxu0 }
 0x225   :  { %v802_v60 = vadd.f32 %v1862_v22, %v801_v1 }
 0x226   :  { %953 = vst [vmem:[#allocation3 + $0x18] sm:$0xff] %v807_v25  ;;  %v1106_v15 = vpop.f32.mrb[2].mxu1 }
 0x227   :  { %952 = vst [vmem:[#allocation3 + $0x10] sm:$0xff] %v802_v60  ;;  %v887_v61 = vadd.f32 %v1106_v15, %v1862_v22  ;;  %v881_v16 = vpop.f32.mrb[3].mxu1 }
 0x228   :  { %v882_v34 = vadd.f32 %v1862_v22, %v881_v16 }
 0x229   :  { %969 = vst [vmem:[#allocation3 + $0x98] sm:$0xff] %v887_v61 }
 0x22a   :  { %968 = vst [vmem:[#allocation3 + $0x90] sm:$0xff] %v882_v34 }
 0x22b   :  { %v1085_v10 = vpop.f32.mrb[4].mxu0 }
 0x22c   :  { %v817_v35 = vadd.f32 %v1085_v10, %v1862_v22  ;;  %v811_v5 = vpop.f32.mrb[5].mxu0 }
 0x22d   :  { %v812_v6 = vadd.f32 %v1862_v22, %v811_v5 }
 0x22e   :  { %955 = vst [vmem:[#allocation3 + $0x28] sm:$0xff] %v817_v35  ;;  %v1109_v38 = vpop.f32.mrb[4].mxu1 }
 0x22f   :  { %954 = vst [vmem:[#allocation3 + $0x20] sm:$0xff] %v812_v6  ;;  %v897_v30 = vadd.f32 %v1109_v38, %v1862_v22  ;;  %v891_v39 = vpop.f32.mrb[5].mxu1 }
 0x230   :  { %v892_v55 = vadd.f32 %v1862_v22, %v891_v39 }
 0x231   :  { %971 = vst [vmem:[#allocation3 + $0xa8] sm:$0xff] %v897_v30 }
 0x232   :  { %970 = vst [vmem:[#allocation3 + $0xa0] sm:$0xff] %v892_v55 }
 0x233   :  { %v1088_v42 = vpop.f32.mrb[6].mxu0 }
 0x234   :  { %v827_v20 = vadd.f32 %v1088_v42, %v1862_v22  ;;  %v821_v17 = vpop.f32.mrb[7].mxu0 }
 0x235   :  { %v822_v29 = vadd.f32 %v1862_v22, %v821_v17 }
 0x236   :  { %957 = vst [vmem:[#allocation3 + $0x38] sm:$0xff] %v827_v20  ;;  %v1112_v46 = vpop.f32.mrb[6].mxu1 }
 0x237   :  { %956 = vst [vmem:[#allocation3 + $0x30] sm:$0xff] %v822_v29  ;;  %v907_v48 = vadd.f32 %v1112_v46, %v1862_v22  ;;  %v901_v31 = vpop.f32.mrb[7].mxu1 }
 0x238   :  { %v902_v32 = vadd.f32 %v1862_v22, %v901_v31 }
 0x239   :  { %973 = vst [vmem:[#allocation3 + $0xb8] sm:$0xff] %v907_v48 }
 0x23a   :  { %972 = vst [vmem:[#allocation3 + $0xb0] sm:$0xff] %v902_v32 }
 0x23b   :  { %v1091_v43 = vpop.f32.mrb[8].mxu0 }
 0x23c   :  { %v837_v49 = vadd.f32 %v1091_v43, %v1862_v22  ;;  %v831_v50 = vpop.f32.mrb[9].mxu0 }
 0x23d   :  { %v832_v51 = vadd.f32 %v1862_v22, %v831_v50 }
 0x23e   :  { %959 = vst [vmem:[#allocation3 + $0x48] sm:$0xff] %v837_v49  ;;  %v1115_v54 = vpop.f32.mrb[8].mxu1 }
 0x23f   :  { %958 = vst [vmem:[#allocation3 + $0x40] sm:$0xff] %v832_v51  ;;  %v917_v8 = vadd.f32 %v1115_v54, %v1862_v22  ;;  %v911_v26 = vpop.f32.mrb[9].mxu1 }
 0x240   :  { %v912_v58 = vadd.f32 %v1862_v22, %v911_v26 }
 0x241   :  { %975 = vst [vmem:[#allocation3 + $0xc8] sm:$0xff] %v917_v8 }
 0x242   :  { %974 = vst [vmem:[#allocation3 + $0xc0] sm:$0xff] %v912_v58 }
 0x243   :  { %v1094_v24 = vpop.f32.mrb[10].mxu0 }
 0x244   :  { %v847_v36 = vadd.f32 %v1094_v24, %v1862_v22  ;;  %v841_v9 = vpop.f32.mrb[11].mxu0 }
 0x245   :  { %v842_v40 = vadd.f32 %v1862_v22, %v841_v9 }
 0x246   :  { %961 = vst [vmem:[#allocation3 + $0x58] sm:$0xff] %v847_v36  ;;  %v1118_v11 = vpop.f32.mrb[10].mxu1 }
 0x247   :  { %960 = vst [vmem:[#allocation3 + $0x50] sm:$0xff] %v842_v40  ;;  %v927_v62 = vadd.f32 %v1118_v11, %v1862_v22  ;;  %v921_v7 = vpop.f32.mrb[11].mxu1 }
 0x248   :  { %v922_v33 = vadd.f32 %v1862_v22, %v921_v7 }
 0x249   :  { %977 = vst [vmem:[#allocation3 + $0xd8] sm:$0xff] %v927_v62 }
 0x24a   :  { %976 = vst [vmem:[#allocation3 + $0xd0] sm:$0xff] %v922_v33 }
 0x24b   :  { %v1097_v52 = vpop.f32.mrb[12].mxu0 }
 0x24c   :  { %v857_v21 = vadd.f32 %v1097_v52, %v1862_v22  ;;  %v851_v47 = vpop.f32.mrb[13].mxu0 }
 0x24d   :  { %v852_v53 = vadd.f32 %v1862_v22, %v851_v47 }
 0x24e   :  { %963 = vst [vmem:[#allocation3 + $0x68] sm:$0xff] %v857_v21  ;;  %v1121_v41 = vpop.f32.mrb[12].mxu1 }
 0x24f   :  { %962 = vst [vmem:[#allocation3 + $0x60] sm:$0xff] %v852_v53  ;;  %v937_v19 = vadd.f32 %v1121_v41, %v1862_v22  ;;  %v931_v63 = vpop.f32.mrb[13].mxu1 }
 0x250   :  { %v932_v59 = vadd.f32 %v1862_v22, %v931_v63 }
 0x251   :  { %979 = vst [vmem:[#allocation3 + $0xe8] sm:$0xff] %v937_v19 }
 0x252   :  { %978 = vst [vmem:[#allocation3 + $0xe0] sm:$0xff] %v932_v59 }
 0x253   :  { %v1100_v12 = vpop.f32.mrb[14].mxu0 }
 0x254   :  { %v867_v14 = vadd.f32 %v1100_v12, %v1862_v22  ;;  %v861_v28 = vpop.f32.mrb[15].mxu0 }
 0x255   :  { %v862_v57 = vadd.f32 %v1862_v22, %v861_v28 }
 0x256   :  { %965 = vst [vmem:[#allocation3 + $0x78] sm:$0xff] %v867_v14  ;;  %v1124_v27 = vpop.f32.mrb[14].mxu1 }
 0x257   :  { %964 = vst [vmem:[#allocation3 + $0x70] sm:$0xff] %v862_v57  ;;  %v947_v18 = vadd.f32 %v1124_v27, %v1862_v22  ;;  %v941_v3 = vpop.f32.mrb[15].mxu1 }
 0x258   :  { %v942_v56 = vadd.f32 %v1862_v22, %v941_v3 }
 0x259   :  { %981 = vst [vmem:[#allocation3 + $0xf8] sm:$0xff] %v947_v18 }
 0x25a   :  { %980 = vst [vmem:[#allocation3 + $0xf0] sm:$0xff] %v942_v56 }
 0x25b   :  { %1215 = shalt.err (!%p1212_p4)
}
 0x25c   :  { %s1216_s21 = scalar_lea.hbm %s1913_s5, 4096 }
 0x25d   :  { %p1217_p5 = scmp.ne.s32.totalorder %s1913_s5, %s1216_s21  ;;  %p1220_p6 = scmp.lt.u32.totalorder %s1216_s21, %s1913_s5 }
 0x25f   :  { %p1222_p7 = pnand %p1220_p6, %p1217_p5 }
 0x261   :  { %1225 = shalt.err (!%p1222_p7)
}
 0x262   :  { %s1229_s26 = smov 128   ;;  %s1230_s27 = smov 8  }
 0x263   :  { %993 = dma.vmem_to_hbm [thread:$0]  %s988_s17, 4096, %s1913_s5, [#allocation4], %s1229_s26, %s1229_s26, %s1230_s27  }
 0x264   :  { %1226 = dma.done.wait [#allocation4], 4096  }
 0x265   :  { %1227 = vsyncadd [#allocation4], 4294963200 }
 0x266   :  { %997 = vsyncpa [#allocation4], 1 }

</bundles_post_ra>
